<compile_context>
chip_gen: v7x
topology: tpu7x:2x2x1
jax: 0.10.0
libtpu: 0.0.40
codegen_flags: <defaults>
</compile_context>

<pallas_src>
import jax
import jax.numpy as jnp
from jax.experimental import pallas as pl
from jax.experimental.pallas import tpu as pltpu

_HIDDEN = 8
_LANES = 128
_SUBLANES = 8
_MAX_BLOCK_PACKED_ROWS = 4096            # per review: 2048-4096 packed rows
_VMEM_IO_BUDGET_BYTES = 16 * 1024 * 1024  # double-buffered activation tiles
_VMEM_LIMIT_BYTES = 28 * 1024 * 1024      # explicit scoped-VMEM limit (all gens)


def _mlp_kernel(x_ref, w1_ref, b1_ref, w2_ref, b2_ref, o_ref):
    # Cast activations to the (bf16) weight dtype for the MXU; accumulate in f32.
    x = x_ref[...].astype(w1_ref.dtype)
    h = jnp.dot(x, w1_ref[...], preferred_element_type=jnp.float32)
    h = jnp.maximum(h + b1_ref[...], 0.0)                 # f32 bias, f32 ReLU
    o = jnp.dot(h.astype(w2_ref.dtype), w2_ref[...],
                preferred_element_type=jnp.float32)
    o = jnp.maximum(o + b2_ref[...], 0.0)
    o_ref[...] = o.astype(o_ref.dtype)


def _pack_factor(num_output: int) -> int:
    """How many batch rows to pack per 128-lane output row."""
    if num_output <= _LANES and _LANES % num_output == 0:
        return _LANES // num_output
    return 1  # fallback: unpacked layout (still correct, just not lane-dense)


def pack_params(w1, b1, w2, b2, *, mxu_dtype=jnp.bfloat16):
    """Precompute packed (block-diagonal, bf16) weights ONCE per parameter set.

    Hoisted out of the per-call forward jit (review item: the kron/tile HLOs and
    the dtype cast must not re-run on every forward call).
    """
    num_input, hidden = w1.shape
    num_output = w2.shape[1]
    P = _pack_factor(num_output)

    b1r = jnp.reshape(b1, (1, hidden)).astype(jnp.float32)
    b2r = jnp.reshape(b2, (1, num_output)).astype(jnp.float32)

    if P > 1:
        eye = jnp.eye(P, dtype=w1.dtype)
        w1p = jnp.kron(eye, w1)                       # (P*num_input, P*hidden)
        w2p = jnp.kron(eye, w2)                       # (P*hidden, P*num_output)
        b1p = jnp.tile(b1r, (1, P))                   # (1, P*hidden)
        b2p = jnp.tile(b2r, (1, P))                   # (1, P*num_output) = (1, 128)
    else:
        w1p, w2p, b1p, b2p = w1, w2, b1r, b2r

    return {
        # Packed, MXU-dtype weights for the kernel (biases stay f32: tiny, exact).
        "w1p": w1p.astype(mxu_dtype), "b1p": b1p.astype(jnp.float32),
        "w2p": w2p.astype(mxu_dtype), "b2p": b2p.astype(jnp.float32),
        # Original small f32 params for the (< P rows) ragged-tail path.
        "w1": w1, "b1": b1r, "w2": w2, "b2": b2r,
    }


def _choose_block_rows(packed_rows, in_w, out_w, weight_bytes):
    """Budget-driven tile size (bytes/step, not a fixed constant)."""
    per_row_bytes = (in_w + out_w) * 4 * 2          # f32 in + out, double-buffered
    avail = _VMEM_IO_BUDGET_BYTES - weight_bytes
    max_rows = max(_SUBLANES, (avail // per_row_bytes) // _SUBLANES * _SUBLANES)
    max_rows = min(max_rows, _MAX_BLOCK_PACKED_ROWS)

    if packed_rows > max_rows:
        return max_rows
    if packed_rows >= 2 * _SUBLANES:
        # >= 2 grid steps so ("parallel",) can shard across both v7x TensorCores.
        return pl.cdiv(pl.cdiv(packed_rows, 2), _SUBLANES) * _SUBLANES
    if packed_rows >= _SUBLANES:
        return _SUBLANES
    return packed_rows  # tiny array: block == full array dim (always legal)


def _packed_forward(xp, w1p, b1p, w2p, b2p):
    packed_rows, in_w = xp.shape
    mid_w = w1p.shape[1]
    out_w = w2p.shape[1]

    weight_bytes = (w1p.size * w1p.dtype.itemsize + w2p.size * w2p.dtype.itemsize
                    + b1p.size * b1p.dtype.itemsize + b2p.size * b2p.dtype.itemsize)
    block_rows = _choose_block_rows(packed_rows, in_w, out_w, weight_bytes)
    grid = (pl.cdiv(packed_rows, block_rows),)   # partial boundary block is fine:
                                                 # per-row math, OOB writes dropped.
    resident = pl.Buffered(1)  # constant-index weights: no second buffer needed.

    return pl.pallas_call(
        _mlp_kernel,
        out_shape=jax.ShapeDtypeStruct((packed_rows, out_w), jnp.float32),
        grid=grid,
        in_specs=[
            # Streamed, double-buffered activation tiles.
            pl.BlockSpec((block_rows, in_w), lambda i: (i, 0)),
            # Weights/biases: constant block index -> fetched once, stay resident.
            pl.BlockSpec((in_w, mid_w), lambda i: (0, 0), pipeline_mode=resident),
            pl.BlockSpec((1, mid_w), lambda i: (0, 0), pipeline_mode=resident),
            pl.BlockSpec((mid_w, out_w), lambda i: (0, 0), pipeline_mode=resident),
            pl.BlockSpec((1, out_w), lambda i: (0, 0), pipeline_mode=resident),
        ],
        out_specs=pl.BlockSpec((block_rows, out_w), lambda i: (i, 0)),
        compiler_params=pltpu.CompilerParams(
            dimension_semantics=("parallel",),       # shard batch tiles across TCs
            vmem_limit_bytes=_VMEM_LIMIT_BYTES,
        ),
    )(xp, w1p, b1p, w2p, b2p)


@jax.jit
def net_forward(x, params):
    """Forward pass of Net.  x: (B, num_input) f32 -> (B, num_output) f32."""
    w1p, b1p, w2p, b2p = params["w1p"], params["b1p"], params["w2p"], params["b2p"]
    w1, b1, w2, b2 = params["w1"], params["b1"], params["w2"], params["b2"]

    batch, num_input = x.shape
    num_output = w2.shape[1]
    P = b2p.shape[1] // num_output

    outs = []
    main = (batch // P) * P
    if main > 0:
        # Free, contiguous row-major reshape: P consecutive batch rows per packed
        # 128-lane row.  Copy-free whenever batch % P == 0 (the x[:main] slice is
        # the identity); no whole-array padding is ever done.
        xp = x[:main].reshape(main // P, P * num_input)
        o_packed = _packed_forward(xp, w1p, b1p, w2p, b2p)
        outs.append(o_packed.reshape(main, num_output))

    rem = batch - main
    if rem > 0:
        # Ragged tail (< P rows): tiny exact plain-JAX path (avoids padding x).
        xt = x[main:]
        ht = jnp.maximum(xt @ w1 + b1, 0.0)
        outs.append(jnp.maximum(ht @ w2 + b2, 0.0))

    return outs[0] if len(outs) == 1 else jnp.concatenate(outs, axis=0)


def init_params(key, num_input, num_output, hidden=_HIDDEN):
    """Deterministic init mirroring nn.Linear's U(-1/sqrt(fan_in), 1/sqrt(fan_in))."""
    k1, k2, k3, k4 = jax.random.split(key, 4)
    bound1 = 1.0 / jnp.sqrt(jnp.float32(num_input))
    bound2 = 1.0 / jnp.sqrt(jnp.float32(hidden))
    w1 = jax.random.uniform(k1, (num_input, hidden), jnp.float32, -bound1, bound1)
    b1 = jax.random.uniform(k2, (1, hidden), jnp.float32, -bound1, bound1)
    w2 = jax.random.uniform(k3, (hidden, num_output), jnp.float32, -bound2, bound2)
    b2 = jax.random.uniform(k4, (1, num_output), jnp.float32, -bound2, bound2)
    return w1, b1, w2, b2


if __name__ == "__main__":
    key = jax.random.PRNGKey(0)
    kx1, kx2, kp = jax.random.split(key, 3)

    num_input, num_output = 16, 4
    w1, b1, w2, b2 = init_params(kp, num_input, num_output)
    params = pack_params(w1, b1, w2, b2)            # packed once, reused per call

    def ref_fn(x):  # pure-JAX f32 reference (same math as the PyTorch forward)
        return jnp.maximum(jnp.maximum(x @ w1 + b1, 0.0) @ w2 + b2, 0.0)

    # Aligned batch (multiple of P=32): fully copy-free path, grid of 2 steps.
    x1 = jax.random.normal(kx1, (512, num_input), jnp.float32)
    out1 = net_forward(x1, params)
    jax.block_until_ready(out1)
    ref1 = ref_fn(x1)
    assert out1.shape == (512, num_output)
    assert jnp.allclose(out1, ref1, atol=2e-2, rtol=2e-2), float(
        jnp.max(jnp.abs(out1 - ref1)))

    # Ragged batch: 256-row kernel prefix + 5-row exact JAX tail.
    x2 = jax.random.normal(kx2, (261, num_input), jnp.float32)
    out2 = net_forward(x2, params)
    jax.block_until_ready(out2)
    ref2 = ref_fn(x2)
    assert out2.shape == (261, num_output)
    assert jnp.allclose(out2, ref2, atol=2e-2, rtol=2e-2), float(
        jnp.max(jnp.abs(out2 - ref2)))

    print("KERNEL_OK")
</pallas_src>

<mosaic_0001>
module attributes {stable_mosaic.version = 11 : i64} {
  func.func @_mlp_kernel(%arg0: i32, %arg1: memref<8x512xf32, #tpu.memory_space<vmem>>, %arg2: memref<512x256xbf16, #tpu.memory_space<vmem>>, %arg3: memref<1x256xf32, #tpu.memory_space<vmem>>, %arg4: memref<256x128xbf16, #tpu.memory_space<vmem>>, %arg5: memref<1x128xf32, #tpu.memory_space<vmem>>, %arg6: memref<8x128xf32, #tpu.memory_space<vmem>>) attributes {dimension_semantics = [#tpu.dimension_semantics<parallel>], iteration_bounds = array<i64: 2>, scalar_prefetch = 0 : i64, scratch_operands = 0 : i64, tpu.core_type = #tpu.core_type<tc>, window_params = [{transform_indices = @transform_0, window_bounds = array<i64: 8, 512>}, {pipeline_mode = #tpu.pipeline_mode<synchronous>, transform_indices = @transform_1, window_bounds = array<i64: 512, 256>}, {pipeline_mode = #tpu.pipeline_mode<synchronous>, transform_indices = @transform_2, window_bounds = array<i64: 1, 256>}, {pipeline_mode = #tpu.pipeline_mode<synchronous>, transform_indices = @transform_3, window_bounds = array<i64: 256, 128>}, {pipeline_mode = #tpu.pipeline_mode<synchronous>, transform_indices = @transform_4, window_bounds = array<i64: 1, 128>}, {transform_indices = @transform_5, window_bounds = array<i64: 8, 128>}]} {
    %c0 = arith.constant 0 : index
    %c0_0 = arith.constant 0 : index
    %0 = vector.load %arg1[%c0, %c0_0] : memref<8x512xf32, #tpu.memory_space<vmem>>, vector<8x512xf32>
    %1 = arith.truncf %0 : vector<8x512xf32> to vector<8x512xbf16>
    %c0_1 = arith.constant 0 : index
    %c0_2 = arith.constant 0 : index
    %2 = vector.load %arg2[%c0_1, %c0_2] : memref<512x256xbf16, #tpu.memory_space<vmem>>, vector<512x256xbf16>
    %cst = arith.constant dense<0.000000e+00> : vector<8x256xf32>
    %3 = tpu.matmul %1, %2, %cst {dimension_numbers = #tpu.dot_dimension_numbers<[1], [0], [0], [1], [0, 0, 1, 1], [], []>} : vector<8x512xbf16>, vector<512x256xbf16>, vector<8x256xf32> -> vector<8x256xf32>
    %c0_3 = arith.constant 0 : index
    %c0_4 = arith.constant 0 : index
    %4 = vector.load %arg3[%c0_3, %c0_4] : memref<1x256xf32, #tpu.memory_space<vmem>>, vector<1x256xf32>
    %5 = vector.broadcast %4 : vector<1x256xf32> to vector<8x256xf32>
    %6 = arith.addf %3, %5 : vector<8x256xf32>
    %cst_5 = arith.constant 0.000000e+00 : f32
    %7 = vector.broadcast %cst_5 : f32 to vector<8x256xf32>
    %8 = arith.maximumf %6, %7 : vector<8x256xf32>
    %9 = arith.truncf %8 : vector<8x256xf32> to vector<8x256xbf16>
    %c0_6 = arith.constant 0 : index
    %c0_7 = arith.constant 0 : index
    %10 = vector.load %arg4[%c0_6, %c0_7] : memref<256x128xbf16, #tpu.memory_space<vmem>>, vector<256x128xbf16>
    %cst_8 = arith.constant dense<0.000000e+00> : vector<8x128xf32>
    %11 = tpu.matmul %9, %10, %cst_8 {dimension_numbers = #tpu.dot_dimension_numbers<[1], [0], [0], [1], [0, 0, 1, 1], [], []>} : vector<8x256xbf16>, vector<256x128xbf16>, vector<8x128xf32> -> vector<8x128xf32>
    %c0_9 = arith.constant 0 : index
    %c0_10 = arith.constant 0 : index
    %12 = vector.load %arg5[%c0_9, %c0_10] : memref<1x128xf32, #tpu.memory_space<vmem>>, vector<1x128xf32>
    %13 = vector.broadcast %12 : vector<1x128xf32> to vector<8x128xf32>
    %14 = arith.addf %11, %13 : vector<8x128xf32>
    %cst_11 = arith.constant 0.000000e+00 : f32
    %15 = vector.broadcast %cst_11 : f32 to vector<8x128xf32>
    %16 = arith.maximumf %14, %15 : vector<8x128xf32>
    %c0_12 = arith.constant 0 : index
    %c0_13 = arith.constant 0 : index
    %17 = vector.load %arg6[%c0_12, %c0_13] : memref<8x128xf32, #tpu.memory_space<vmem>>, vector<8x128xf32>
    tpu.vector_store %arg6[%c0_12, %c0_13], %16 {strides = array<i32>} : memref<8x128xf32, #tpu.memory_space<vmem>>, vector<8x128xf32>,
    return
  }
  func.func @transform_0(%arg0: i32) -> (i32, i32) {
    %c0_i32 = arith.constant 0 : i32
    %c0_i32_0 = arith.constant 0 : i32
    return %arg0, %c0_i32 : i32, i32
  }
  func.func @transform_1(%arg0: i32) -> (i32, i32) {
    %c0_i32 = arith.constant 0 : i32
    %c0_i32_0 = arith.constant 0 : i32
    %c0_i32_1 = arith.constant 0 : i32
    return %c0_i32, %c0_i32_0 : i32, i32
  }
  func.func @transform_2(%arg0: i32) -> (i32, i32) {
    %c0_i32 = arith.constant 0 : i32
    %c0_i32_0 = arith.constant 0 : i32
    %c0_i32_1 = arith.constant 0 : i32
    return %c0_i32, %c0_i32_0 : i32, i32
  }
  func.func @transform_3(%arg0: i32) -> (i32, i32) {
    %c0_i32 = arith.constant 0 : i32
    %c0_i32_0 = arith.constant 0 : i32
    %c0_i32_1 = arith.constant 0 : i32
    return %c0_i32, %c0_i32_0 : i32, i32
  }
  func.func @transform_4(%arg0: i32) -> (i32, i32) {
    %c0_i32 = arith.constant 0 : i32
    %c0_i32_0 = arith.constant 0 : i32
    %c0_i32_1 = arith.constant 0 : i32
    return %c0_i32, %c0_i32_0 : i32, i32
  }
  func.func @transform_5(%arg0: i32) -> (i32, i32) {
    %c0_i32 = arith.constant 0 : i32
    %c0_i32_0 = arith.constant 0 : i32
    return %arg0, %c0_i32 : i32, i32
  }
}

</mosaic_0001>

<bundles_post_ra>
// kernel: net_forward.1
= control target key start
LH: loop header
LB: loop body
LE: loop exit
PB: predicated region body
PF: predicated region fallthrough
CT: control target
= control target key end

     0   :  { %s1220_s18 = smov 0   ;;  %s1497_s0 = inlined_call_operand.vmem [shape: f32[16,512], index: 0, kind: input, shape index: {}]   ;;  %s1498_s1 = inlined_call_operand.vmem [shape: bf16[512,256], index: 1, kind: input, shape index: {}]   ;;  %s1499_s2 = inlined_call_operand.vmem [shape: f32[1,256], index: 2, kind: input, shape index: {}]   ;;  %s1500_s3 = inlined_call_operand.vmem [shape: bf16[256,128], index: 3, kind: input, shape index: {}]   ;;  %s1501_s4 = inlined_call_operand.vmem [shape: f32[1,128], index: 4, kind: input, shape index: {}]   ;;  %s1502_s5 = inlined_call_operand.vmem [shape: f32[16,128], index: 5, kind: output, shape index: {}]  }
   0x1 LB: > { %s944_s19 = sadd.s32 4294967295, %s1188_s18   ;;  %p948_p0 = scmp.ge.s32.totalorder %s1188_s18, 1  ;;  %s1188_s18 = sphi %s1220_s18, %s15_s18  }
   0x2   : > { %p187_p1 = scmp.lt.s32.totalorder %s1188_s18, 3 }
   0x4   : > { %p188_p2 = pnand %p948_p0, %p187_p1 }
   0x5   : > { %v1070_v0 = vld [vmem:[%s1498_s1 + $0x4] ss:$8 sps:$4 sm:$0xff] (!%p188_p2)   ;;  %v1074_v2 = vld [vmem:[%s1498_s1] ss:$8 sps:$4 sm:$0xff] (!%p188_p2)   ;;  %v1076_v4 = vld [vmem:[%s1498_s1 + $0x14] ss:$8 sps:$4 sm:$0xff] (!%p188_p2)  }
   0x6   : > { %191 = sbr.rel (%p188_p2) target bundleno = 512 (0x200), region = 40  ;;  %v1072_v1 = vld [vmem:[%s1498_s1 + $0x104] ss:$8 sps:$4 sm:$0xff] (!%p188_p2)   ;;  %628 = vmatprep.subr.bf16.mxu1 (!%p188_p2), %v1070_v0  ;;  %v1075_v3 = vld [vmem:[%s1498_s1 + $0x100] ss:$8 sps:$4 sm:$0xff] (!%p188_p2)   ;;  %p214_p3 = scmp.lt.s32.totalorder (!%p188_p2), %s944_s19, 1 }
   0x7   : > { %669 = vmatprep.subr.bf16.mxu0 (!%p188_p2), %v1072_v1  ;;  %629 = vmatpush1.bf16.msra.mxu1 (!%p188_p2), %v1074_v2  ;;  %v1078_v5 = vld [vmem:[%s1498_s1 + $0x114] ss:$8 sps:$4 sm:$0xff] (!%p188_p2)   ;;  %v1080_v6 = vld [vmem:[%s1498_s1 + $0x10] ss:$8 sps:$4 sm:$0xff] (!%p188_p2)   ;;  %v1082_v8 = vld [vmem:[%s1498_s1 + $0x24] ss:$8 sps:$4 sm:$0xff] (!%p188_p2)  }
   0x8   : > { %670 = vmatpush1.bf16.msra.mxu0 (!%p188_p2), %v1075_v3  ;;  %630 = vmatprep.subr.bf16.mxu1 (!%p188_p2), %v1076_v4  ;;  %v1081_v7 = vld [vmem:[%s1498_s1 + $0x110] ss:$8 sps:$4 sm:$0xff] (!%p188_p2)   ;;  %v1084_v9 = vld [vmem:[%s1498_s1 + $0x124] ss:$8 sps:$4 sm:$0xff] (!%p188_p2)   ;;  %v1086_v10 = vld [vmem:[%s1498_s1 + $0x20] ss:$8 sps:$4 sm:$0xff] (!%p188_p2)  }
   0x9   : > { %671 = vmatprep.subr.bf16.mxu0 (!%p188_p2), %v1078_v5  ;;  %v1087_v11 = vld [vmem:[%s1498_s1 + $0x120] ss:$8 sps:$4 sm:$0xff] (!%p188_p2)   ;;  %v1088_v12 = vld [vmem:[%s1498_s1 + $0x34] ss:$8 sps:$4 sm:$0xff] (!%p188_p2)   ;;  %v1092_v14 = vld [vmem:[%s1498_s1 + $0x30] ss:$8 sps:$4 sm:$0xff] (!%p188_p2)  }
   0xa   : > { %v1090_v13 = vld [vmem:[%s1498_s1 + $0x134] ss:$8 sps:$4 sm:$0xff] (!%p188_p2)   ;;  %v1093_v15 = vld [vmem:[%s1498_s1 + $0x130] ss:$8 sps:$4 sm:$0xff] (!%p188_p2)   ;;  %v1094_v16 = vld [vmem:[%s1498_s1 + $0x44] ss:$8 sps:$4 sm:$0xff] (!%p188_p2)  }
   0xb   : > { %631 = vmatpush1.bf16.msra.mxu1 (!%p188_p2), %v1080_v6  ;;  %v1096_v17 = vld [vmem:[%s1498_s1 + $0x144] ss:$8 sps:$4 sm:$0xff] (!%p188_p2)   ;;  %v1098_v18 = vld [vmem:[%s1498_s1 + $0x40] ss:$8 sps:$4 sm:$0xff] (!%p188_p2)   ;;  %v1100_v20 = vld [vmem:[%s1498_s1 + $0x54] ss:$8 sps:$4 sm:$0xff] (!%p188_p2)  }
   0xc   : > { %672 = vmatpush1.bf16.msra.mxu0 (!%p188_p2), %v1081_v7  ;;  %632 = vmatprep.subr.bf16.mxu1 (!%p188_p2), %v1082_v8  ;;  %v1099_v19 = vld [vmem:[%s1498_s1 + $0x140] ss:$8 sps:$4 sm:$0xff] (!%p188_p2)   ;;  %v1102_v21 = vld [vmem:[%s1498_s1 + $0x154] ss:$8 sps:$4 sm:$0xff] (!%p188_p2)   ;;  %v1104_v22 = vld [vmem:[%s1498_s1 + $0x50] ss:$8 sps:$4 sm:$0xff] (!%p188_p2)  }
   0xd   : > { %673 = vmatprep.subr.bf16.mxu0 %v1084_v9  ;;  %v1105_v23 = vld [vmem:[%s1498_s1 + $0x150] ss:$8 sps:$4 sm:$0xff]   ;;  %v1106_v24 = vld [vmem:[%s1498_s1 + $0x64] ss:$8 sps:$4 sm:$0xff]   ;;  %v1110_v26 = vld [vmem:[%s1498_s1 + $0x60] ss:$8 sps:$4 sm:$0xff]  }
   0xe   : > { %v1108_v25 = vld [vmem:[%s1498_s1 + $0x164] ss:$8 sps:$4 sm:$0xff]   ;;  %v1111_v27 = vld [vmem:[%s1498_s1 + $0x160] ss:$8 sps:$4 sm:$0xff]   ;;  %v1112_v28 = vld [vmem:[%s1498_s1 + $0x74] ss:$8 sps:$4 sm:$0xff]  }
   0xf   : > { %633 = vmatpush1.bf16.msra.mxu1 %v1086_v10  ;;  %v1114_v29 = vld [vmem:[%s1498_s1 + $0x174] ss:$8 sps:$4 sm:$0xff]   ;;  %v1116_v30 = vld [vmem:[%s1498_s1 + $0x70] ss:$8 sps:$4 sm:$0xff]   ;;  %v1118_v32 = vld [vmem:[%s1498_s1 + $0x84] ss:$8 sps:$4 sm:$0xff]  }
  0x10   : > { %674 = vmatpush1.bf16.msra.mxu0 %v1087_v11  ;;  %634 = vmatprep.subr.bf16.mxu1 %v1088_v12  ;;  %v1117_v31 = vld [vmem:[%s1498_s1 + $0x170] ss:$8 sps:$4 sm:$0xff]   ;;  %v1120_v33 = vld [vmem:[%s1498_s1 + $0x184] ss:$8 sps:$4 sm:$0xff]   ;;  %v1122_v34 = vld [vmem:[%s1498_s1 + $0x80] ss:$8 sps:$4 sm:$0xff]  }
  0x11   : > { %675 = vmatprep.subr.bf16.mxu0 %v1090_v13  ;;  %v1123_v35 = vld [vmem:[%s1498_s1 + $0x180] ss:$8 sps:$4 sm:$0xff]   ;;  %v1124_v36 = vld [vmem:[%s1498_s1 + $0x94] ss:$8 sps:$4 sm:$0xff]   ;;  %s1504_s19 = smov (!%p214_p3, %s944_s19), 1 }
  0x12   : > { %v1126_v37 = vld [vmem:[%s1498_s1 + $0x194] ss:$8 sps:$4 sm:$0xff]   ;;  %v1128_v38 = vld [vmem:[%s1498_s1 + $0x90] ss:$8 sps:$4 sm:$0xff]   ;;  %v1130_v40 = vld [vmem:[%s1498_s1 + $0xa4] ss:$8 sps:$4 sm:$0xff]  }
  0x13   : > { %635 = vmatpush1.bf16.msra.mxu1 %v1092_v14  ;;  %v1129_v39 = vld [vmem:[%s1498_s1 + $0x190] ss:$8 sps:$4 sm:$0xff]   ;;  %s1035_s8 = sshll.u32 %s1504_s19, 5  ;;  %v1132_v41 = vld [vmem:[%s1498_s1 + $0x1a4] ss:$8 sps:$4 sm:$0xff]   ;;  %s951_s28 = sshll.u32 %s1504_s19, 3 }
  0x14   : > { %676 = vmatpush1.bf16.msra.mxu0 %v1093_v15  ;;  %636 = vmatprep.subr.bf16.mxu1 %v1094_v16  ;;  %v1134_v42 = vld [vmem:[%s1498_s1 + $0xa0] ss:$8 sps:$4 sm:$0xff]   ;;  %s1370_s17 = scalar_lea.vmem %s1497_s0, %s1035_s8  ;;  %v1136_v44 = vld [vmem:[%s1498_s1 + $0xb4] ss:$8 sps:$4 sm:$0xff]   ;;  %v1140_v47 = vld [vmem:[%s1498_s1 + $0xb0] ss:$8 sps:$4 sm:$0xff]   ;;  %s222_s6 = scalar_lea.vmem %s1502_s5, %s951_s28 }
  0x15   : > { %677 = vmatprep.subr.bf16.mxu0 %v1096_v17  ;;  %v1135_v43 = vld [vmem:[%s1498_s1 + $0x1a0] ss:$8 sps:$4 sm:$0xff]   ;;  %v1138_v45 = vld [vmem:[%s1498_s1 + $0x1b4] ss:$8 sps:$4 sm:$0xff]   ;;  %v1141_v48 = vld [vmem:[%s1498_s1 + $0x1b0] ss:$8 sps:$4 sm:$0xff]  }
  0x16   : > { %v225_v46 = vld [vmem:[%s1370_s17 + $0x8] sm:$0xff]  ;;  %v227_v50 = vld [vmem:[%s1370_s17 + $0x18] sm:$0xff]  ;;  %v224_v4 = vld [vmem:[%s1370_s17] sm:$0xff] }
  0x17   : > { %637 = vmatpush1.bf16.msra.mxu1 %v1098_v18  ;;  %v229_v49 = vpack.c.bf16 %v225_v46, %v225_v46  ;;  %v1142_v51 = vld [vmem:[%s1498_s1 + $0xc4] ss:$8 sps:$4 sm:$0xff]   ;;  %v231_v52 = vpack.c.bf16 %v227_v50, %v227_v50  ;;  %v1146_v54 = vld [vmem:[%s1498_s1 + $0xc0] ss:$8 sps:$4 sm:$0xff]   ;;  %v1148_v56 = vld [vmem:[%s1498_s1 + $0xd4] ss:$8 sps:$4 sm:$0xff]   ;;  %v228_v7 = vpack.c.bf16 %v224_v4, %v224_v4 }
  0x18   : > { %678 = vmatpush1.bf16.msra.mxu0 %v1099_v19  ;;  %638 = vmatprep.subr.bf16.mxu1 %v1100_v20  ;;  %v1144_v53 = vld [vmem:[%s1498_s1 + $0x1c4] ss:$8 sps:$4 sm:$0xff]   ;;  %v1147_v55 = vld [vmem:[%s1498_s1 + $0x1c0] ss:$8 sps:$4 sm:$0xff]   ;;  %v1150_v57 = vld [vmem:[%s1498_s1 + $0x1d4] ss:$8 sps:$4 sm:$0xff]  }
  0x19   : > { %679 = vmatprep.subr.bf16.mxu0 %v1102_v21  ;;  %660 = vmatprep.mubr.bf16.mxu1 %v229_v49  ;;  %v1152_v58 = vld [vmem:[%s1498_s1 + $0xd0] ss:$8 sps:$4 sm:$0xff]   ;;  %v1154_v60 = vld [vmem:[%s1498_s1 + $0xe4] ss:$8 sps:$4 sm:$0xff]   ;;  %v1158_v62 = vld [vmem:[%s1498_s1 + $0xe0] ss:$8 sps:$4 sm:$0xff]  }
  0x1a   : > { %701 = vmatprep.mubr.bf16.mxu0 %v231_v52  ;;  %v1153_v59 = vld [vmem:[%s1498_s1 + $0x1d0] ss:$8 sps:$4 sm:$0xff]   ;;  %v1156_v61 = vld [vmem:[%s1498_s1 + $0x1e4] ss:$8 sps:$4 sm:$0xff]   ;;  %v1159_v63 = vld [vmem:[%s1498_s1 + $0x1e0] ss:$8 sps:$4 sm:$0xff]  }
  0x1b   : > { %639 = vmatpush1.bf16.msra.mxu1 %v1104_v22  ;;  %v1160_v0 = vld [vmem:[%s1498_s1 + $0xf4] ss:$8 sps:$4 sm:$0xff]   ;;  %v1164_v2 = vld [vmem:[%s1498_s1 + $0xf0] ss:$8 sps:$4 sm:$0xff]   ;;  %v1166_v6 = vld [vmem:[%s1500_s3 + $0x40] sm:$0xff]  }
  0x1c   : > { %680 = vmatpush1.bf16.msra.mxu0 %v1105_v23  ;;  %640 = vmatprep.subr.bf16.mxu1 %v1106_v24  ;;  %v1162_v1 = vld [vmem:[%s1498_s1 + $0x1f4] ss:$8 sps:$4 sm:$0xff]   ;;  %v1165_v3 = vld [vmem:[%s1498_s1 + $0x1f0] ss:$8 sps:$4 sm:$0xff]   ;;  %v1167_v9 = vld [vmem:[%s1500_s3] sm:$0xff]   ;;  %v298_v24 = vlaneseq }
  0x1d   : > { %681 = vmatprep.subr.bf16.mxu0 %v1108_v25  ;;  %v226_v5 = vld [vmem:[%s1370_s17 + $0x10] sm:$0xff]  ;;  %v1168_v10 = vld [vmem:[%s1500_s3 + $0x48] sm:$0xff]   ;;  %v1172_v14 = vld [vmem:[%s1500_s3 + $0x58] sm:$0xff]  }
  0x1e   : > { %v230_v8 = vpack.c.bf16 %v226_v5, %v226_v5  ;;  %v1169_v11 = vld [vmem:[%s1500_s3 + $0x8] sm:$0xff]   ;;  %v1170_v12 = vld [vmem:[%s1500_s3 + $0x50] sm:$0xff]   ;;  %v1173_v15 = vld [vmem:[%s1500_s3 + $0x18] sm:$0xff]   ;;  %v299_v25 = vshrl.u32 %v298_v24, 7 }
  0x1f   : > { %641 = vmatpush1.bf16.msra.mxu1 %v1110_v26  ;;  %v1171_v13 = vld [vmem:[%s1500_s3 + $0x10] sm:$0xff]   ;;  %v1174_v16 = vld [vmem:[%s1500_s3 + $0x60] sm:$0xff]   ;;  %v1176_v18 = vld [vmem:[%s1500_s3 + $0x68] sm:$0xff]  }
  0x20   : > { %682 = vmatpush1.bf16.msra.mxu0 %v1111_v27  ;;  %642 = vmatprep.subr.bf16.mxu1 %v1112_v28  ;;  %v1175_v17 = vld [vmem:[%s1500_s3 + $0x20] sm:$0xff]   ;;  %v1177_v19 = vld [vmem:[%s1500_s3 + $0x28] sm:$0xff]   ;;  %v1178_v20 = vld [vmem:[%s1500_s3 + $0x70] sm:$0xff]   ;;  %v300_v26 = vsub.s32 0, %v299_v25  ;;  %v304_v28 = vsub.s32 1, %v299_v25 }
  0x21   : > { %683 = vmatprep.subr.bf16.mxu0 %v1114_v29  ;;  %v1179_v21 = vld [vmem:[%s1500_s3 + $0x30] sm:$0xff]   ;;  %v1180_v22 = vld [vmem:[%s1500_s3 + $0x78] sm:$0xff]   ;;  %v296_v27 = vld [vmem:[%s1499_s2] sm:$0x3] }
  0x22   : > { %v1181_v23 = vld [vmem:[%s1500_s3 + $0x38] sm:$0xff]   ;;  %v301_v29 = vrot.slane %v296_v27, %v300_v26 }
  0x23   : > { %643 = vmatpush1.bf16.msra.mxu1 %v1116_v30  ;;  %v305_v30 = vrot.slane %v296_v27, %v304_v28 }
  0x24   : > { %684 = vmatpush1.bf16.msra.mxu0 %v1117_v31  ;;  %644 = vmatprep.subr.bf16.mxu1 %v1118_v32 }
  0x25   : > { %685 = vmatprep.subr.bf16.mxu0 %v1120_v33 }
  0x27   : > { %645 = vmatpush1.bf16.msra.mxu1 %v1122_v34 }
  0x28   : > { %686 = vmatpush1.bf16.msra.mxu0 %v1123_v35  ;;  %646 = vmatprep.subr.bf16.mxu1 %v1124_v36 }
  0x29   : > { %687 = vmatprep.subr.bf16.mxu0 %v1126_v37 }
  0x2b   : > { %647 = vmatpush1.bf16.msra.mxu1 %v1128_v38 }
  0x2c   : > { %688 = vmatpush1.bf16.msra.mxu0 %v1129_v39  ;;  %648 = vmatprep.subr.bf16.mxu1 %v1130_v40 }
  0x2d   : > { %689 = vmatprep.subr.bf16.mxu0 %v1132_v41 }
  0x2f   : > { %649 = vmatpush1.bf16.msra.mxu1 %v1134_v42 }
  0x30   : > { %690 = vmatpush1.bf16.msra.mxu0 %v1135_v43  ;;  %650 = vmatprep.subr.bf16.mxu1 %v1136_v44 }
  0x31   : > { %691 = vmatprep.subr.bf16.mxu0 %v1138_v45 }
  0x33   : > { %651 = vmatpush1.bf16.msra.mxu1 %v1140_v47 }
  0x34   : > { %692 = vmatpush1.bf16.msra.mxu0 %v1141_v48  ;;  %652 = vmatprep.subr.bf16.mxu1 %v1142_v51  ;;  %v1016_v48 = vld [vmem:[%s1501_s4] ss:$0 sm:$0xff] }
  0x35   : > { %693 = vmatprep.subr.bf16.mxu0 %v1144_v53 }
  0x37   : > { %653 = vmatpush1.bf16.msra.mxu1 %v1146_v54 }
  0x38   : > { %694 = vmatpush1.bf16.msra.mxu0 %v1147_v55  ;;  %654 = vmatprep.subr.bf16.mxu1 %v1148_v56 }
  0x39   : > { %695 = vmatprep.subr.bf16.mxu0 %v1150_v57 }
  0x3b   : > { %655 = vmatpush1.bf16.msra.mxu1 %v1152_v58 }
  0x3c   : > { %696 = vmatpush1.bf16.msra.mxu0 %v1153_v59  ;;  %656 = vmatprep.subr.bf16.mxu1 %v1154_v60 }
  0x3d   : > { %697 = vmatprep.subr.bf16.mxu0 %v1156_v61 }
  0x3f   : > { %657 = vmatpush1.bf16.msra.mxu1 %v1158_v62 }
  0x40   : > { %698 = vmatpush1.bf16.msra.mxu0 %v1159_v63  ;;  %658 = vmatprep.subr.bf16.mxu1 %v1160_v0 }
  0x41   : > { %699 = vmatprep.subr.bf16.mxu0 %v1162_v1 }
  0x43   : > { %659 = vmatpush1.bf16.msra.mxu1 %v1164_v2 }
  0x44   : > { %700 = vmatpush1.bf16.msra.mxu0 %v1165_v3  ;;  %1036 = vmatprep.subr.bf16.mxu1 %v1166_v6 }
  0x46   : > { %661 = vmatmul.mubr.bf16.vlgmr.msra.gmra.mrb[0].mxu1 %v228_v7 }
  0x47   : > { %702 = vmatmul.mubr.bf16.vlgmr.msra.gmra.mrb[0].mxu0 %v230_v8  ;;  %1037 = vmatpush3.bf16.msra.mxu1 %v1167_v9 }
  0x48   : > { %1038 = vmatprep.subr.bf16.mxu1 %v1168_v10 }
  0x4b   : > { %1039 = vmatpush3.bf16.msra.mxu1 %v1169_v11 }
  0x4c   : > { %1040 = vmatprep.subr.bf16.mxu1 %v1170_v12 }
  0x4f   : > { %1041 = vmatpush3.bf16.msra.mxu1 %v1171_v13 }
  0x50   : > { %1042 = vmatprep.subr.bf16.mxu1 %v1172_v14 }
  0x53   : > { %1043 = vmatpush3.bf16.msra.mxu1 %v1173_v15 }
  0x54   : > { %1044 = vmatprep.subr.bf16.mxu1 %v1174_v16 }
  0x57   : > { %1045 = vmatpush3.bf16.msra.mxu1 %v1175_v17 }
  0x58   : > { %1046 = vmatprep.subr.bf16.mxu1 %v1176_v18 }
  0x5b   : > { %1047 = vmatpush3.bf16.msra.mxu1 %v1177_v19 }
  0x5c   : > { %1048 = vmatprep.subr.bf16.mxu1 %v1178_v20 }
  0x5f   : > { %1049 = vmatpush3.bf16.msra.mxu1 %v1179_v21 }
  0x60   : > { %1050 = vmatprep.subr.bf16.mxu1 %v1180_v22 }
  0x63   : > { %1051 = vmatpush3.bf16.msra.mxu1 %v1181_v23 }
 0x119   : > { %v662_v31 = vpop.f32.mrb[0].mxu1 }
 0x11a   : > { %v703_v32 = vpop.f32.mrb[0].mxu0  ;;  %v663_v33 = vadd.f32 %v662_v31, %v301_v29  ;;  %v664_v34 = vpop.f32.mrb[1].mxu1 }
 0x11b   : > { %v705_v35 = vpop.f32.mrb[1].mxu0  ;;  %v665_v36 = vadd.f32 %v664_v34, %v305_v30  ;;  %v666_v37 = vpop.f32.mrb[2].mxu1 }
 0x11c   : > { %v707_v38 = vpop.f32.mrb[2].mxu0  ;;  %v704_v39 = vadd.f32 %v703_v32, %v663_v33  ;;  %v667_v40 = vpop.f32.mrb[3].mxu1 }
 0x11d   : > { %v708_v41 = vpop.f32.mrb[3].mxu0  ;;  %v706_v42 = vadd.f32 %v705_v35, %v665_v36 }
 0x11e   : > { %v710_v43 = vmax.f32 %v704_v39, 0.0 }
 0x11f   : > { %v711_v44 = vmax.f32 %v706_v42, 0.0 }
 0x120   : > { %v712_v46 = vpack.c.bf16 %v710_v43, %v710_v43 }
 0x121   : > { %v713_v45 = vpack.c.bf16 %v711_v44, %v711_v44 }
 0x123   : > { %881 = vmatprep.mubr.bf16.mxu1 %v713_v45 }
 0x124   : > { %882 = vmatmul.mubr.bf16.vlgmr.msra.gmra.mrb[4].mxu1 %v712_v46 }
 0x1f7   : > { %v1052_v47 = vpop.f32.mrb[4].mxu1 }
 0x1f8   : > { %v1053_v49 = vpop.f32.mrb[5].mxu1 }
 0x1f9   : > { %v1054_v50 = vadd.f32 %v1053_v49, %v1052_v47  ;;  %v1055_v51 = vpop.f32.mrb[6].mxu1 }
 0x1fa   : > { %v1056_v52 = vpop.f32.mrb[7].mxu1 }
 0x1fb   : > { %v884_v53 = vadd.f32 %v1054_v50, %v1016_v48 }
 0x1fd   : > { %v889_v54 = vmax.f32 %v884_v53, 0.0 }
 0x1ff   : > { %890 = vst [vmem:[%s222_s6] sm:$0xff] %v889_v54 }
 0x200 PF: > { %s15_s18 = sadd.s32 1, %s1188_s18  }
 0x201   : > { %p12_p4 = scmp.ge.s32.totalorder %s15_s18, 4  }
 0x203   :  { %14 = sbr.rel (!%p12_p4) target bundleno = 1 (0x1), region = 70 }

</bundles_post_ra>
